<compile_context>
chip_gen: v5e
topology: v5e:2x2
jax: 0.10.0
libtpu: 0.0.40
codegen_flags: <defaults>
</compile_context>

<pallas_src>
import jax
import jax.numpy as jnp
from jax.experimental import pallas as pl
from jax.experimental.pallas import tpu as pltpu

D_IN = 512     # embedding dim coming out of the resnet backbone
D_HID = 128
D_OUT = 2


def _round_up(n, m):
    return ((n + m - 1) // m) * m


def classifier_head_kernel(x_ref, w1_ref, b1_ref, wd_ref, bd_ref, o_ref):
    # x:  [tb, 512] f32 (cast to bf16 in-kernel; the VPU cast hides under the DMA)
    # w1: [512, 128] bf16, b1: [1, 128] f32
    # wd: [128, 1] f32  (= w2[:,1] - w2[:,0]),  bd: [1, 1] f32 (= b2[1] - b2[0])
    # o:  [tb, 2] f32 class probabilities

    # Linear(512 -> 128): bf16 MXU matmul, f32 accumulation.
    x_bf = x_ref[...].astype(jnp.bfloat16)
    h = jnp.dot(x_bf, w1_ref[...], preferred_element_type=jnp.float32)
    h = jnp.maximum(h + b1_ref[...], 0.0)          # bias + ReLU, f32 on the VPU

    # Dropout(p=0.5): identity in eval/inference mode.
    # TODO(synk): training-mode dropout would need pltpu.prng_seed/prng_random_bits.

    # Linear(128 -> 2) + Softmax(dim=1) folded into the logit difference:
    #   softmax([l0, l1])[1] == sigmoid(l1 - l0)
    d = jnp.dot(h, wd_ref[...], preferred_element_type=jnp.float32) + bd_ref[...]  # [tb, 1]
    p1 = pl.reciprocal(1.0 + jnp.exp(-d), approx=True)     # EUP exp + EUP recip
    p0 = 1.0 - p1                                           # p0 + p1 == 1 exactly

    o_ref[...] = jnp.concatenate([p0, p1], axis=1).astype(o_ref.dtype)


def tuning_classifier(x, w1, b1, w2, b2, *, tile_b=2048):
    """x: [B, 512] f32 embeddings (resnet output) -> class probabilities [B, 2] f32."""
    B = x.shape[0]

    # Batch tile: as large as possible (amortizes per-step overhead), capped so the
    # grid has >= 2 steps when B allows it (v7x megacore), and 8-aligned.
    half = _round_up(pl.cdiv(B, 2), 8)
    tb = max(8, min(tile_b, half))

    grid = (pl.cdiv(B, tb),)   # ragged last block handled by Pallas (no jnp.pad)

    # One-time weight prep (tiny; fine to keep in the wrapper).
    w1_bf = w1.astype(jnp.bfloat16)
    b1_2d = b1.reshape(1, D_HID).astype(jnp.float32)
    w_diff = (w2[:, 1] - w2[:, 0]).reshape(D_HID, 1).astype(jnp.float32)
    b_diff = (b2[1] - b2[0]).reshape(1, 1).astype(jnp.float32)

    return pl.pallas_call(
        classifier_head_kernel,
        out_shape=jax.ShapeDtypeStruct((B, D_OUT), jnp.float32),
        grid=grid,
        in_specs=[
            pl.BlockSpec((tb, D_IN), lambda i: (i, 0)),       # x tile, pipelined over batch
            pl.BlockSpec((D_IN, D_HID), lambda i: (0, 0)),    # w1 stays VMEM-resident
            pl.BlockSpec((1, D_HID), lambda i: (0, 0)),       # b1
            pl.BlockSpec((D_HID, 1), lambda i: (0, 0)),       # w_diff
            pl.BlockSpec((1, 1), lambda i: (0, 0)),           # b_diff
        ],
        out_specs=pl.BlockSpec((tb, D_OUT), lambda i: (i, 0)),
        compiler_params=pltpu.CompilerParams(
            dimension_semantics=("parallel",),
        ),
    )(x, w1_bf, b1_2d, w_diff, b_diff)


def init_params(key):
    # Deterministic init mimicking torch.nn.Linear default: U(-1/sqrt(fan_in), 1/sqrt(fan_in)).
    k1, k2, k3, k4 = jax.random.split(key, 4)
    bound1 = 1.0 / jnp.sqrt(jnp.float32(D_IN))
    bound2 = 1.0 / jnp.sqrt(jnp.float32(D_HID))
    w1 = jax.random.uniform(k1, (D_IN, D_HID), jnp.float32, -bound1, bound1)
    b1 = jax.random.uniform(k2, (D_HID,), jnp.float32, -bound1, bound1)
    w2 = jax.random.uniform(k3, (D_HID, D_OUT), jnp.float32, -bound2, bound2)
    b2 = jax.random.uniform(k4, (D_OUT,), jnp.float32, -bound2, bound2)
    return w1, b1, w2, b2


if __name__ == "__main__":
    B = 8
    key = jax.random.PRNGKey(0)
    kx, kp = jax.random.split(key)

    # Stand-in for resnet(x): deterministic 512-d embeddings.
    x = jax.random.normal(kx, (B, D_IN), jnp.float32)
    w1, b1, w2, b2 = init_params(kp)

    probs = tuning_classifier(x, w1, b1, w2, b2)
    probs = jax.block_until_ready(probs)

    # Reference in plain JAX with the same bf16-input / f32-accumulate first matmul.
    h_ref = jnp.maximum(
        jnp.dot(x.astype(jnp.bfloat16), w1.astype(jnp.bfloat16),
                preferred_element_type=jnp.float32) + b1, 0.0)
    logits_ref = h_ref @ w2 + b2
    ref = jax.nn.softmax(logits_ref, axis=1)

    assert probs.shape == (B, D_OUT)
    assert jnp.allclose(probs, ref, atol=2e-3, rtol=2e-3)
    assert jnp.allclose(jnp.sum(probs, axis=1), 1.0, atol=1e-5)

    print("KERNEL_OK")
</pallas_src>

<mosaic_0001>
module attributes {stable_mosaic.version = 11 : i64} {
  func.func @classifier_head_kernel(%arg0: i32, %arg1: memref<8x512xf32, #tpu.memory_space<vmem>>, %arg2: memref<512x128xbf16, #tpu.memory_space<vmem>>, %arg3: memref<1x128xf32, #tpu.memory_space<vmem>>, %arg4: memref<128x1xf32, #tpu.memory_space<vmem>>, %arg5: memref<1x1xf32, #tpu.memory_space<vmem>>, %arg6: memref<8x2xf32, #tpu.memory_space<vmem>>) attributes {dimension_semantics = [#tpu.dimension_semantics<parallel>], iteration_bounds = array<i64: 1>, scalar_prefetch = 0 : i64, scratch_operands = 0 : i64, tpu.core_type = #tpu.core_type<tc>, window_params = [{transform_indices = @transform_0, window_bounds = array<i64: 8, 512>}, {pipeline_mode = #tpu.pipeline_mode<synchronous>, transform_indices = @transform_1, window_bounds = array<i64: 512, 128>}, {pipeline_mode = #tpu.pipeline_mode<synchronous>, transform_indices = @transform_2, window_bounds = array<i64: 1, 128>}, {pipeline_mode = #tpu.pipeline_mode<synchronous>, transform_indices = @transform_3, window_bounds = array<i64: 128, 1>}, {pipeline_mode = #tpu.pipeline_mode<synchronous>, transform_indices = @transform_4, window_bounds = array<i64: 1, 1>}, {transform_indices = @transform_5, window_bounds = array<i64: 8, 2>}]} {
    %c0 = arith.constant 0 : index
    %c0_0 = arith.constant 0 : index
    %0 = vector.load %arg1[%c0, %c0_0] : memref<8x512xf32, #tpu.memory_space<vmem>>, vector<8x512xf32>
    %1 = arith.truncf %0 : vector<8x512xf32> to vector<8x512xbf16>
    %c0_1 = arith.constant 0 : index
    %c0_2 = arith.constant 0 : index
    %2 = vector.load %arg2[%c0_1, %c0_2] : memref<512x128xbf16, #tpu.memory_space<vmem>>, vector<512x128xbf16>
    %cst = arith.constant dense<0.000000e+00> : vector<8x128xf32>
    %3 = tpu.matmul %1, %2, %cst {dimension_numbers = #tpu.dot_dimension_numbers<[1], [0], [0], [1], [0, 0, 1, 1], [], []>} : vector<8x512xbf16>, vector<512x128xbf16>, vector<8x128xf32> -> vector<8x128xf32>
    %c0_3 = arith.constant 0 : index
    %c0_4 = arith.constant 0 : index
    %4 = vector.load %arg3[%c0_3, %c0_4] : memref<1x128xf32, #tpu.memory_space<vmem>>, vector<1x128xf32>
    %5 = vector.broadcast %4 : vector<1x128xf32> to vector<8x128xf32>
    %6 = arith.addf %3, %5 : vector<8x128xf32>
    %cst_5 = arith.constant 0.000000e+00 : f32
    %7 = vector.broadcast %cst_5 : f32 to vector<8x128xf32>
    %8 = arith.maximumf %6, %7 : vector<8x128xf32>
    %c0_6 = arith.constant 0 : index
    %c0_7 = arith.constant 0 : index
    %9 = vector.load %arg4[%c0_6, %c0_7] : memref<128x1xf32, #tpu.memory_space<vmem>>, vector<128x1xf32>
    %cst_8 = arith.constant dense<0.000000e+00> : vector<8x1xf32>
    %10 = tpu.matmul %8, %9, %cst_8 {dimension_numbers = #tpu.dot_dimension_numbers<[1], [0], [0], [1], [0, 0, 1, 1], [], []>} : vector<8x128xf32>, vector<128x1xf32>, vector<8x1xf32> -> vector<8x1xf32>
    %c0_9 = arith.constant 0 : index
    %c0_10 = arith.constant 0 : index
    %11 = vector.load %arg5[%c0_9, %c0_10] : memref<1x1xf32, #tpu.memory_space<vmem>>, vector<1x1xf32>
    %12 = vector.broadcast %11 : vector<1x1xf32> to vector<8x1xf32>
    %13 = arith.addf %10, %12 : vector<8x1xf32>
    %cst_11 = arith.constant 0.000000e+00 : f32
    %14 = vector.broadcast %cst_11 : f32 to vector<8x1xf32>
    %15 = arith.subf %14, %13 : vector<8x1xf32>
    %16 = math.exp %15 : vector<8x1xf32>
    %cst_12 = arith.constant 1.000000e+00 : f32
    %17 = vector.broadcast %cst_12 : f32 to vector<8x1xf32>
    %18 = arith.addf %17, %16 : vector<8x1xf32>
    %19 = tpu.reciprocal %18 {approx = true} : vector<8x1xf32> -> vector<8x1xf32>
    %cst_13 = arith.constant 1.000000e+00 : f32
    %20 = vector.broadcast %cst_13 : f32 to vector<8x1xf32>
    %21 = arith.subf %20, %19 : vector<8x1xf32>
    %22 = tpu.concatenate %21, %19 in 1 : vector<8x1xf32>, vector<8x1xf32> -> vector<8x2xf32>
    %c0_14 = arith.constant 0 : index
    %c0_15 = arith.constant 0 : index
    %23 = vector.load %arg6[%c0_14, %c0_15] : memref<8x2xf32, #tpu.memory_space<vmem>>, vector<8x2xf32>
    tpu.vector_store %arg6[%c0_14, %c0_15], %22 {strides = array<i32>} : memref<8x2xf32, #tpu.memory_space<vmem>>, vector<8x2xf32>,
    return
  }
  func.func @transform_0(%arg0: i32) -> (i32, i32) {
    %c0_i32 = arith.constant 0 : i32
    %c0_i32_0 = arith.constant 0 : i32
    return %arg0, %c0_i32 : i32, i32
  }
  func.func @transform_1(%arg0: i32) -> (i32, i32) {
    %c0_i32 = arith.constant 0 : i32
    %c0_i32_0 = arith.constant 0 : i32
    %c0_i32_1 = arith.constant 0 : i32
    return %c0_i32, %c0_i32_0 : i32, i32
  }
  func.func @transform_2(%arg0: i32) -> (i32, i32) {
    %c0_i32 = arith.constant 0 : i32
    %c0_i32_0 = arith.constant 0 : i32
    %c0_i32_1 = arith.constant 0 : i32
    return %c0_i32, %c0_i32_0 : i32, i32
  }
  func.func @transform_3(%arg0: i32) -> (i32, i32) {
    %c0_i32 = arith.constant 0 : i32
    %c0_i32_0 = arith.constant 0 : i32
    %c0_i32_1 = arith.constant 0 : i32
    return %c0_i32, %c0_i32_0 : i32, i32
  }
  func.func @transform_4(%arg0: i32) -> (i32, i32) {
    %c0_i32 = arith.constant 0 : i32
    %c0_i32_0 = arith.constant 0 : i32
    %c0_i32_1 = arith.constant 0 : i32
    return %c0_i32, %c0_i32_0 : i32, i32
  }
  func.func @transform_5(%arg0: i32) -> (i32, i32) {
    %c0_i32 = arith.constant 0 : i32
    %c0_i32_0 = arith.constant 0 : i32
    return %arg0, %c0_i32 : i32, i32
  }
}

</mosaic_0001>

<bundles_post_ra>
// kernel: tpu_custom_call.1
= control target key start
LH: loop header
LB: loop body
LE: loop exit
PB: predicated region body
PF: predicated region fallthrough
CT: control target
= control target key end

     0   :  { %s720_s0 = inlined_call_operand.vmem [shape: f32[8,512], index: 0, kind: input, shape index: {}]   ;;  %s721_s1 = inlined_call_operand.hbm [shape: bf16[512,128], index: 1, kind: input, shape index: {}]   ;;  %s722_s2 = inlined_call_operand.vmem [shape: f32[1,128], index: 2, kind: input, shape index: {}]   ;;  %s723_s3 = inlined_call_operand.vmem [shape: f32[128,1], index: 3, kind: input, shape index: {}]   ;;  %s724_s4 = inlined_call_operand.<no memory space> [shape: f32[1,1], index: 4, kind: input, shape index: {}]   ;;  %s725_s5 = inlined_call_operand.vmem [shape: f32[8,2], index: 5, kind: output, shape index: {}]  }
   0x1   :  { %v10_v0 = vstv %s724_s4 }
   0x2   :  { %11 = vst [vmem:[#allocation2] sm:$0x1] %v10_v0 }
   0x3   :  { %12 = vsyncpa [#allocation4], 0  ;;  %s19_s22 = sshll.u32 %s721_s1, 4  ;;  %s614_s23 = smov [#allocation3]   ;;  %s20_s22 = int_to_ptr.hbm [resolvable:$true] %s19_s22 }
   0x4   :  { %s21_s24 = sshll.u32 %s614_s23, 4  ;;  %s615_s25 = smov 64   ;;  %s22_s24 = int_to_ptr.vmem [resolvable:$true] %s21_s24 }
   0x5   :  { %s616_s26 = smov 4  }
   0x6   :  { %27 = dma.hbm_to_vmem [thread:$0]  %s20_s22, 4096, %s22_s24, [#allocation4], %s615_s25, %s615_s25, %s616_s26  }
   0x7   :  { %612 = dma.done.wait [#allocation4], 4096  }
   0x8   :  { %613 = vsyncadd [#allocation4], 4294963200  ;;  %v553_v1 = vld [vmem:[#allocation3 + $0x38] sm:$0xff]  ;;  %v552_v5 = vld [vmem:[#allocation3 + $0x30] sm:$0xff]  ;;  %vm409_vm0 = vcmask 7168   ;;  %vm411_vm1 = vcmask 15360  }
   0x9   :  { %v561_v2 = vld [vmem:[#allocation3 + $0x78] sm:$0xff]  ;;  %306 = vmatpush.bf16.msra.mxu0 %v553_v1  ;;  %v560_v6 = vld [vmem:[#allocation3 + $0x70] sm:$0xff]  ;;  %v551_v9 = vld [vmem:[#allocation3 + $0x28] sm:$0xff] }
   0xa   :  { %v569_v3 = vld [vmem:[#allocation3 + $0xb8] sm:$0xff]  ;;  %319 = vmatpush.bf16.msra.mxu1 %v561_v2  ;;  %v568_v7 = vld [vmem:[#allocation3 + $0xb0] sm:$0xff]  ;;  %v559_v10 = vld [vmem:[#allocation3 + $0x68] sm:$0xff] }
   0xb   :  { %v577_v4 = vld [vmem:[#allocation3 + $0xf8] sm:$0xff]  ;;  %332 = vmatpush.bf16.msra.mxu2 %v569_v3  ;;  %v576_v8 = vld [vmem:[#allocation3 + $0xf0] sm:$0xff]  ;;  %v567_v11 = vld [vmem:[#allocation3 + $0xa8] sm:$0xff] }
   0xc   :  { %345 = vmatpush.bf16.msra.mxu3 %v577_v4  ;;  %v575_v12 = vld [vmem:[#allocation3 + $0xe8] sm:$0xff]  ;;  %v550_v13 = vld [vmem:[#allocation3 + $0x20] sm:$0xff]  ;;  %v549_v17 = vld [vmem:[#allocation3 + $0x18] sm:$0xff] }
   0xd   :  { %307 = vmatpush.bf16.msra.mxu0 %v552_v5  ;;  %v558_v14 = vld [vmem:[#allocation3 + $0x60] sm:$0xff]  ;;  %v557_v18 = vld [vmem:[#allocation3 + $0x58] sm:$0xff]  ;;  %v548_v21 = vld [vmem:[#allocation3 + $0x10] sm:$0xff] }
   0xe   :  { %320 = vmatpush.bf16.msra.mxu1 %v560_v6  ;;  %v566_v15 = vld [vmem:[#allocation3 + $0xa0] sm:$0xff]  ;;  %v565_v19 = vld [vmem:[#allocation3 + $0x98] sm:$0xff]  ;;  %v556_v22 = vld [vmem:[#allocation3 + $0x50] sm:$0xff] }
   0xf   :  { %333 = vmatpush.bf16.msra.mxu2 %v568_v7  ;;  %v574_v16 = vld [vmem:[#allocation3 + $0xe0] sm:$0xff]  ;;  %v573_v20 = vld [vmem:[#allocation3 + $0xd8] sm:$0xff]  ;;  %v564_v23 = vld [vmem:[#allocation3 + $0x90] sm:$0xff] }
  0x10   :  { %346 = vmatpush.bf16.msra.mxu3 %v576_v8  ;;  %v572_v24 = vld [vmem:[#allocation3 + $0xd0] sm:$0xff]  ;;  %v547_v25 = vld [vmem:[#allocation3 + $0x8] sm:$0xff]  ;;  %v546_v29 = vld [vmem:[#allocation3] sm:$0xff] }
  0x11   :  { %308 = vmatpush.bf16.msra.mxu0 %v551_v9  ;;  %v555_v26 = vld [vmem:[#allocation3 + $0x48] sm:$0xff]  ;;  %v554_v30 = vld [vmem:[#allocation3 + $0x40] sm:$0xff]  ;;  %v41_v36 = vld [vmem:[%s720_s0 + $0x18] sm:$0xff] }
  0x12   :  { %321 = vmatpush.bf16.msra.mxu1 %v559_v10  ;;  %v563_v27 = vld [vmem:[#allocation3 + $0x88] sm:$0xff]  ;;  %v562_v31 = vld [vmem:[#allocation3 + $0x80] sm:$0xff]  ;;  %v374_v39 = vld [vmem:[%s723_s3 + $0x78] sm:$0xff]  ;;  %v45_v41 = vpack.c.bf16 %v41_v36, %v41_v36 }
  0x13   :  { %334 = vmatpush.bf16.msra.mxu2 %v567_v11  ;;  %v571_v28 = vld [vmem:[#allocation3 + $0xc8] sm:$0xff]  ;;  %v38_v32 = vld [vmem:[%s720_s0] sm:$0xff]  ;;  %v370_v45 = vld [vmem:[%s723_s3 + $0x58] sm:$0xff] }
  0x14   :  { %347 = vmatpush.bf16.msra.mxu3 %v575_v12  ;;  %v39_v33 = vld [vmem:[%s720_s0 + $0x8] sm:$0xff]  ;;  %v40_v35 = vld [vmem:[%s720_s0 + $0x10] sm:$0xff]  ;;  %v42_v37 = vpack.c.bf16 %v38_v32, %v38_v32  ;;  %v371_v44 = vld [vmem:[%s723_s3 + $0x60] sm:$0xff] }
  0x15   :  { %309 = vmatpush.bf16.msra.mxu0 %v550_v13  ;;  %v570_v34 = vld [vmem:[#allocation3 + $0xc0] sm:$0xff]  ;;  %v43_v38 = vpack.c.bf16 %v39_v33, %v39_v33  ;;  %v44_v40 = vpack.c.bf16 %v40_v35, %v40_v35  ;;  %v373_v42 = vld [vmem:[%s723_s3 + $0x70] sm:$0xff]  ;;  %v366_v49 = vld [vmem:[%s723_s3 + $0x38] sm:$0xff] }
  0x16   :  { %322 = vmatpush.bf16.msra.mxu1 %v558_v14  ;;  %v372_v43 = vld [vmem:[%s723_s3 + $0x68] sm:$0xff]  ;;  %v369_v46 = vld [vmem:[%s723_s3 + $0x50] sm:$0xff]  ;;  %v367_v48 = vld [vmem:[%s723_s3 + $0x40] sm:$0xff] }
  0x17   :  { %335 = vmatpush.bf16.msra.mxu2 %v566_v15  ;;  %v368_v47 = vld [vmem:[%s723_s3 + $0x48] sm:$0xff]  ;;  %v365_v50 = vld [vmem:[%s723_s3 + $0x30] sm:$0xff]  ;;  %v363_v52 = vld [vmem:[%s723_s3 + $0x20] sm:$0xff] }
  0x18   :  { %348 = vmatpush.bf16.msra.mxu3 %v574_v16  ;;  %v364_v51 = vld [vmem:[%s723_s3 + $0x28] sm:$0xff]  ;;  %v362_v53 = vld [vmem:[%s723_s3 + $0x18] sm:$0xff]  ;;  %v361_v54 = vld [vmem:[%s723_s3 + $0x10] sm:$0xff] }
  0x19   :  { %310 = vmatpush.bf16.msra.mxu0 %v549_v17  ;;  %v360_v55 = vld [vmem:[%s723_s3 + $0x8] sm:$0xff]  ;;  %v359_v56 = vld [vmem:[%s723_s3] sm:$0xff] }
  0x1a   :  { %323 = vmatpush.bf16.msra.mxu1 %v557_v18  ;;  %v582_v57 = vld [vmem:[%s722_s2] ss:$0 sm:$0xff]  ;;  %s617_s2 = smov 1  }
  0x1b   :  { %336 = vmatpush.bf16.msra.mxu2 %v565_v19  ;;  %v583_v7 = vld [vmem:[#allocation2] ss:$0 sm:$0xff] }
  0x1c   :  { %349 = vmatpush.bf16.msra.mxu3 %v573_v20 }
  0x1d   :  { %311 = vmatpush.bf16.msra.mxu0 %v548_v21 }
  0x1e   :  { %324 = vmatpush.bf16.msra.mxu1 %v556_v22 }
  0x1f   :  { %337 = vmatpush.bf16.msra.mxu2 %v564_v23 }
  0x20   :  { %350 = vmatpush.bf16.msra.mxu3 %v572_v24 }
  0x21   :  { %312 = vmatpush.bf16.msra.mxu0 %v547_v25 }
  0x22   :  { %325 = vmatpush.bf16.msra.mxu1 %v555_v26 }
  0x23   :  { %338 = vmatpush.bf16.msra.mxu2 %v563_v27 }
  0x24   :  { %351 = vmatpush.bf16.msra.mxu3 %v571_v28 }
  0x25   :  { %313 = vmatpush.bf16.msra.mxu0 %v546_v29 }
  0x26   :  { %326 = vmatpush.bf16.msra.mxu1 %v554_v30 }
  0x27   :  { %339 = vmatpush.bf16.msra.mxu2 %v562_v31 }
  0x28   :  { %352 = vmatpush.bf16.msra.mxu3 %v570_v34  ;;  %314 = vmatmul.bf16.vlgmr.msra.gmra.mxu0 %v42_v37 }
  0x29   :  { %379 = vmatpush.msrb.mxu0 %v374_v39  ;;  %327 = vmatmul.bf16.vlgmr.msra.gmra.mxu1 %v43_v38 }
  0x2a   :  { %340 = vmatmul.bf16.vlgmr.msra.gmra.mxu2 %v44_v40 }
  0x2b   :  { %353 = vmatmul.bf16.vlgmr.msra.gmra.mxu3 %v45_v41  ;;  %380 = vmatpush.msrb.mxu0 %v373_v42 }
  0x2d   :  { %381 = vmatpush.msrb.mxu0 %v372_v43 }
  0x2f   :  { %382 = vmatpush.msrb.mxu0 %v371_v44 }
  0x31   :  { %383 = vmatpush.msrb.mxu0 %v370_v45 }
  0x33   :  { %384 = vmatpush.msrb.mxu0 %v369_v46 }
  0x35   :  { %385 = vmatpush.msrb.mxu0 %v368_v47 }
  0x37   :  { %386 = vmatpush.msrb.mxu0 %v367_v48 }
  0x39   :  { %387 = vmatpush.msrb.mxu0 %v366_v49 }
  0x3b   :  { %388 = vmatpush.msrb.mxu0 %v365_v50 }
  0x3d   :  { %389 = vmatpush.msrb.mxu0 %v364_v51 }
  0x3f   :  { %390 = vmatpush.msrb.mxu0 %v363_v52 }
  0x41   :  { %391 = vmatpush.msrb.mxu0 %v362_v53 }
  0x43   :  { %392 = vmatpush.msrb.mxu0 %v361_v54 }
  0x45   :  { %393 = vmatpush.msrb.mxu0 %v360_v55 }
  0x47   :  { %394 = vmatpush.msrb.mxu0 %v359_v56 }
  0xa5   :  { %v315_v58 = vpop.f32.mrf.mxu0 }
  0xa6   :  { %v328_v59 = vpop.f32.mrf.mxu1  ;;  %v316_v60 = vadd.f32 %v582_v57, %v315_v58 }
  0xa8   :  { %v329_v61 = vadd.f32 %v328_v59, %v316_v60 }
  0xad   :  { %v341_v62 = vpop.f32.mrf.mxu2  ;;  %v317_v1 = vpop.f32.mrf.mxu0 }
  0xae   :  { %v354_v63 = vpop.f32.mrf.mxu3  ;;  %v342_v0 = vadd.f32 %v341_v62, %v329_v61  ;;  %v330_v2 = vpop.f32.mrf.mxu1 }
  0xb0   :  { %v355_v3 = vadd.f32 %v354_v63, %v342_v0 }
  0xb2   :  { %v358_v4 = vmax.f32 %v355_v3, 0.0 }
  0xb4   :  { %395 = vmatmul.f32.vlgmr.msrb.gmra.mxu0 %v358_v4 }
  0xb5   :  { %v343_v5 = vpop.f32.mrf.mxu2 }
  0xb6   :  { %v356_v6 = vpop.f32.mrf.mxu3 }
 0x131   :  { %v396_v8 = vpop.f32.mrf.mxu0 }
 0x132   :  { %v397_v9 = vadd.f32 %v583_v7, %v396_v8 }
 0x134   :  { %v399_v10 = vsub.f32 0.0, %v397_v9 }
 0x136   :  { %v400_v11 = vmul.f32 1.442695, %v399_v10 }
 0x138   :  { %584 = vpow2.f32 %v400_v11 }
 0x13e   :  { %v585_v12 = vpop.eup %584 }
 0x13f   :  { %v402_v13 = vadd.f32 1.0, %v585_v12 }
 0x141   :  { %586 = vrcp.f32 %v402_v13 }
 0x147   :  { %v587_v14 = vpop.eup %586 }
 0x148   :  { %406 = vrot.lane.b32.xlu0 %v587_v14, %s617_s2  ;;  %v404_v15 = vsub.f32 1.0, %v587_v14 }
 0x1ba   :  { %v407_v16 = vpop.permute.xlu0 %406 }
 0x1bb   :  { %v410_v17 = vsel %vm409_vm0, %v404_v15, %v407_v16 }
 0x1bc   :  { %412 = vst.msk [vmem:[%s725_s5] sm:$0xff] %vm411_vm1, %v410_v17 }
 0x1bd   :  { %417 = vsyncpa [#allocation4], 1 }

</bundles_post_ra>
